<compile_context>
chip_gen: v7x
topology: tpu7x:2x2x1
jax: 0.10.0
libtpu: 0.0.40
codegen_flags: <defaults>
</compile_context>

<pallas_src>
import jax
import jax.numpy as jnp
import numpy as np
from jax.experimental import pallas as pl
from jax.experimental.pallas import tpu as pltpu


CAP_DIM = 8  # the PyTorch .view(..., 8) hardcodes groups of 8


# ----------------------------------------------------------------------------
# Kernel
# ----------------------------------------------------------------------------
def primarycaps_kernel(x_ref, w_ref, o_ref):
    """x_ref: (B, K) bf16; w_ref: (8, K, TM) bf16 (leading tile dim squeezed);
    o_ref: (8, B, TM) f32.

    Pass 1: 8 slab matmuls (one per within-group position t); each un-scaled
            y_t is stored to o_ref[t] immediately so only the running squared
            norm + one y tile stay live (no vreg spills at large B), while the
            group-of-8 squared norm accumulates on the VPU.
    Pass 2: re-read the slabs from VMEM (cheap vld) and apply the squash scale.
    """
    x = x_ref[...]                                            # (B, K) bf16

    sq = None
    for t in range(CAP_DIM):
        y_t = jnp.dot(x, w_ref[t], preferred_element_type=jnp.float32)  # (B, TM) f32
        o_ref[t] = y_t                                        # full unmasked store
        sq = y_t * y_t if sq is None else sq + y_t * y_t      # (B, TM) f32

    # squash scale = sq / ((1 + sq) * sqrt(sq) + 1e-9); divide via EUP reciprocal.
    scale = sq * pl.reciprocal((1.0 + sq) * jnp.sqrt(sq) + 1e-9, approx=True)

    for t in range(CAP_DIM):
        o_ref[t] = o_ref[t] * scale                           # second VMEM pass


# ----------------------------------------------------------------------------
# One-time parameter packing (hoisted out of the forward pass)
# ----------------------------------------------------------------------------
def _choose_tm(M, K, B, *, vmem_budget_bytes=12 << 20, max_tm=2048):
    """Pick a lane-tile width over the capsule axis M.

    Prefers >= 2 grid steps (so the 'parallel' axis shards over v7x's two
    TensorCores), then 256-lane multiples (full-width pushes on v6e/v7x's
    256-wide MXU), then the widest tile that fits a double-buffered VMEM
    budget well under the 32 MiB scoped default of every generation.
    """
    def vmem_bytes(tm):
        w = CAP_DIM * K * tm * 2     # bf16 weight tile
        o = CAP_DIM * B * tm * 4     # f32 output tile
        return 2 * (w + o) + B * K * 2   # double-buffered tiles + resident x

    candidates = []
    for step in (256, 128):
        tm = step
        while tm <= min(max_tm, M):
            if M % tm == 0 and vmem_bytes(tm) <= vmem_budget_bytes:
                candidates.append(tm)
            tm += step
    if not candidates:
        # TODO(synk): for M not divisible by 128 (e.g. in_features=904 default),
        # pad M up to a 128-multiple with zero weight columns and slice after.
        return M
    return max(candidates, key=lambda tm: (M // tm >= 2, tm % 256 == 0, tm))


def pack_primarycaps_weights(W, *, tm=None, batch_hint=256):
    """One-time repack of the per-capsule nn.Linear weights (do NOT call per step).

    W: (N, 256, K) float32 — nn.Linear weight layout (out, in) per capsule.
    Returns (w_tiles, tm) with w_tiles: (grid_m, 8, K, tm) bf16, contiguous per
    grid step so each step's weight DMA is a single long run.
    """
    N, H, K = W.shape
    D = H * N
    assert D % CAP_DIM == 0
    M = D // CAP_DIM                 # number of 8-dim capsule vectors
    if tm is None:
        tm = _choose_tm(M, K, batch_hint)
    assert M % tm == 0
    grid_m = M // tm

    # Column f = h*N + i of w_flat holds W[i, h, :]  (torch.stack(dim=2)+view order).
    w_flat = jnp.transpose(W, (1, 0, 2)).reshape(D, K).T                 # (K, D)
    # Slab layout: w_slab[t, k, m] = w_flat[k, m*8 + t].
    w_slab = jnp.transpose(w_flat.reshape(K, M, CAP_DIM), (2, 0, 1))     # (8, K, M)
    # Per-tile-contiguous: w_tiles[j, t, k, m'] = w_slab[t, k, j*tm + m'].
    w_tiles = jnp.transpose(w_slab.reshape(CAP_DIM, K, grid_m, tm), (2, 0, 1, 3))
    return w_tiles.astype(jnp.bfloat16), tm


# ----------------------------------------------------------------------------
# Forward
# ----------------------------------------------------------------------------
def primarycaps_forward(x, w_tiles, *, slab_layout=False):
    """x: (B, K) float; w_tiles: (grid_m, 8, K, tm) bf16 from pack_primarycaps_weights.

    Returns (B, M, 8) f32 matching the PyTorch module, or — with
    slab_layout=True — the lane-dense (8, B, M) slab so a downstream routing
    matmul can skip the reorder.
    """
    B, K = x.shape
    grid_m, cap, K2, tm = w_tiles.shape
    assert cap == CAP_DIM and K2 == K
    M = grid_m * tm
    D = M * CAP_DIM

    x_bf16 = x.astype(jnp.bfloat16)

    grid_spec = pltpu.PrefetchScalarGridSpec(
        num_scalar_prefetch=0,
        grid=(grid_m,),
        in_specs=[
            # x stays resident across the whole grid (same block every step).
            pl.BlockSpec((B, K), lambda j: (0, 0)),
            # One contiguous pre-packed weight slab per step; leading dim squeezed.
            pl.BlockSpec((pl.Squeezed(), CAP_DIM, K, tm), lambda j: (j, 0, 0, 0)),
        ],
        out_specs=pl.BlockSpec((CAP_DIM, B, tm), lambda j: (0, 0, j)),
    )

    cost = pl.CostEstimate(
        flops=2 * B * K * D + 12 * B * M,          # 8 slab matmuls + squash VPU work
        transcendentals=2 * B * M,                 # sqrt + reciprocal per capsule
        bytes_accessed=B * K * 2 + w_tiles.size * 2 + CAP_DIM * B * M * 4,
    )

    out_slab = pl.pallas_call(
        primarycaps_kernel,
        out_shape=jax.ShapeDtypeStruct((CAP_DIM, B, M), jnp.float32),
        grid_spec=grid_spec,
        compiler_params=pltpu.CompilerParams(
            dimension_semantics=("parallel",)),
        cost_estimate=cost,
    )(x_bf16, w_tiles)

    if slab_layout:
        return out_slab
    # out[b, m, t] = out_slab[t, b, m]  — the PyTorch .view ordering. Pure layout
    # glue; pass slab_layout=True to skip this extra HBM round trip when the
    # consumer can read the slab layout directly.
    return jnp.transpose(out_slab, (1, 2, 0))


# ----------------------------------------------------------------------------
# Pure-JAX reference
# ----------------------------------------------------------------------------
def primarycaps_reference(x, W):
    """Pure-JAX f32 reference mirroring the PyTorch forward exactly."""
    B, K = x.shape
    N, H, _ = W.shape
    y = jnp.einsum("bk,ihk->bhi", x, W)          # (B, 256, N), stacked on dim=2
    D = H * N
    z = y.reshape(B, D // CAP_DIM, CAP_DIM)
    sq = jnp.sum(z * z, axis=-1, keepdims=True)
    return sq * z / ((1.0 + sq) * jnp.sqrt(sq) + 1e-9)


if __name__ == "__main__":
    # Small shapes consistent with the module: in_features=32, out_features=4
    # -> num_primary_caps = 8 capsules of Linear(32, 256, bias=False).
    B = 8                      # demo batch; production contract is B >= 128/256
    in_features = 32
    out_features = 4
    hidden = 256
    num_primary_caps = in_features // out_features  # 8

    key = jax.random.PRNGKey(0)
    kx, kw = jax.random.split(key)
    x = jax.random.normal(kx, (B, in_features), dtype=jnp.float32)
    # nn.Linear weight layout: (out, in) per capsule.
    W = 0.05 * jax.random.normal(
        kw, (num_primary_caps, hidden, in_features), dtype=jnp.float32)

    # One-time packing (hoisted out of the forward — cache this with the params).
    w_tiles, tm = pack_primarycaps_weights(W, batch_hint=B)

    fwd = jax.jit(primarycaps_forward)
    out = jax.block_until_ready(fwd(x, w_tiles))

    ref = primarycaps_reference(x, W)
    # bf16 MXU inputs + approx EUP reciprocal -> loosened tolerance vs f32 ref.
    np.testing.assert_allclose(np.asarray(out), np.asarray(ref),
                               rtol=3e-2, atol=3e-2)
    assert out.shape == (B, hidden * num_primary_caps // CAP_DIM, CAP_DIM)

    print("KERNEL_OK")
</pallas_src>

<mosaic_0001>
module attributes {stable_mosaic.version = 11 : i64} {
  func.func @primarycaps_kernel(%arg0: i32, %arg1: memref<8x32xbf16, #tpu.memory_space<vmem>>, %arg2: memref<1x8x32x128xbf16, #tpu.memory_space<vmem>>, %arg3: memref<8x8x128xf32, #tpu.memory_space<vmem>>) attributes {dimension_semantics = [#tpu.dimension_semantics<parallel>], iteration_bounds = array<i64: 2>, scalar_prefetch = 0 : i64, scratch_operands = 0 : i64, tpu.core_type = #tpu.core_type<tc>, window_params = [{pipeline_mode = #tpu.pipeline_mode<synchronous>, transform_indices = @transform_0, window_bounds = array<i64: 8, 32>}, {transform_indices = @transform_1, window_bounds = array<i64: 1, 8, 32, 128>}, {transform_indices = @transform_2, window_bounds = array<i64: 8, 8, 128>}]} {
    %c0 = arith.constant 0 : index
    %c0_0 = arith.constant 0 : index
    %0 = vector.load %arg1[%c0, %c0_0] : memref<8x32xbf16, #tpu.memory_space<vmem>>, vector<8x32xbf16>
    %c0_1 = arith.constant 0 : index
    %c0_2 = arith.constant 0 : index
    %c0_3 = arith.constant 0 : index
    %c0_4 = arith.constant 0 : index
    %1 = vector.load %arg2[%c0_1, %c0_2, %c0_3, %c0_4] : memref<1x8x32x128xbf16, #tpu.memory_space<vmem>>, vector<1x1x32x128xbf16>
    %2 = vector.shape_cast %1 : vector<1x1x32x128xbf16> to vector<32x128xbf16>
    %cst = arith.constant dense<0.000000e+00> : vector<8x128xf32>
    %3 = tpu.matmul %0, %2, %cst {dimension_numbers = #tpu.dot_dimension_numbers<[1], [0], [0], [1], [0, 0, 1, 1], [], []>} : vector<8x32xbf16>, vector<32x128xbf16>, vector<8x128xf32> -> vector<8x128xf32>
    %c0_5 = arith.constant 0 : index
    %c0_6 = arith.constant 0 : index
    %c0_7 = arith.constant 0 : index
    %4 = vector.load %arg3[%c0_5, %c0_6, %c0_7] : memref<8x8x128xf32, #tpu.memory_space<vmem>>, vector<1x8x128xf32>
    %5 = vector.shape_cast %4 : vector<1x8x128xf32> to vector<8x128xf32>
    %6 = vector.shape_cast %3 : vector<8x128xf32> to vector<1x8x128xf32>
    tpu.vector_store %arg3[%c0_5, %c0_6, %c0_7], %6 {strides = array<i32>} : memref<8x8x128xf32, #tpu.memory_space<vmem>>, vector<1x8x128xf32>,
    %7 = arith.mulf %3, %3 : vector<8x128xf32>
    %c0_8 = arith.constant 0 : index
    %c1 = arith.constant 1 : index
    %c0_9 = arith.constant 0 : index
    %c0_10 = arith.constant 0 : index
    %8 = vector.load %arg2[%c0_8, %c1, %c0_9, %c0_10] : memref<1x8x32x128xbf16, #tpu.memory_space<vmem>>, vector<1x1x32x128xbf16>
    %9 = vector.shape_cast %8 : vector<1x1x32x128xbf16> to vector<32x128xbf16>
    %cst_11 = arith.constant dense<0.000000e+00> : vector<8x128xf32>
    %10 = tpu.matmul %0, %9, %cst_11 {dimension_numbers = #tpu.dot_dimension_numbers<[1], [0], [0], [1], [0, 0, 1, 1], [], []>} : vector<8x32xbf16>, vector<32x128xbf16>, vector<8x128xf32> -> vector<8x128xf32>
    %c1_12 = arith.constant 1 : index
    %c0_13 = arith.constant 0 : index
    %c0_14 = arith.constant 0 : index
    %11 = vector.load %arg3[%c1_12, %c0_13, %c0_14] : memref<8x8x128xf32, #tpu.memory_space<vmem>>, vector<1x8x128xf32>
    %12 = vector.shape_cast %11 : vector<1x8x128xf32> to vector<8x128xf32>
    %13 = vector.shape_cast %10 : vector<8x128xf32> to vector<1x8x128xf32>
    tpu.vector_store %arg3[%c1_12, %c0_13, %c0_14], %13 {strides = array<i32>} : memref<8x8x128xf32, #tpu.memory_space<vmem>>, vector<1x8x128xf32>,
    %14 = arith.mulf %10, %10 : vector<8x128xf32>
    %15 = arith.addf %7, %14 : vector<8x128xf32>
    %c0_15 = arith.constant 0 : index
    %c2 = arith.constant 2 : index
    %c0_16 = arith.constant 0 : index
    %c0_17 = arith.constant 0 : index
    %16 = vector.load %arg2[%c0_15, %c2, %c0_16, %c0_17] : memref<1x8x32x128xbf16, #tpu.memory_space<vmem>>, vector<1x1x32x128xbf16>
    %17 = vector.shape_cast %16 : vector<1x1x32x128xbf16> to vector<32x128xbf16>
    %cst_18 = arith.constant dense<0.000000e+00> : vector<8x128xf32>
    %18 = tpu.matmul %0, %17, %cst_18 {dimension_numbers = #tpu.dot_dimension_numbers<[1], [0], [0], [1], [0, 0, 1, 1], [], []>} : vector<8x32xbf16>, vector<32x128xbf16>, vector<8x128xf32> -> vector<8x128xf32>
    %c2_19 = arith.constant 2 : index
    %c0_20 = arith.constant 0 : index
    %c0_21 = arith.constant 0 : index
    %19 = vector.load %arg3[%c2_19, %c0_20, %c0_21] : memref<8x8x128xf32, #tpu.memory_space<vmem>>, vector<1x8x128xf32>
    %20 = vector.shape_cast %19 : vector<1x8x128xf32> to vector<8x128xf32>
    %21 = vector.shape_cast %18 : vector<8x128xf32> to vector<1x8x128xf32>
    tpu.vector_store %arg3[%c2_19, %c0_20, %c0_21], %21 {strides = array<i32>} : memref<8x8x128xf32, #tpu.memory_space<vmem>>, vector<1x8x128xf32>,
    %22 = arith.mulf %18, %18 : vector<8x128xf32>
    %23 = arith.addf %15, %22 : vector<8x128xf32>
    %c0_22 = arith.constant 0 : index
    %c3 = arith.constant 3 : index
    %c0_23 = arith.constant 0 : index
    %c0_24 = arith.constant 0 : index
    %24 = vector.load %arg2[%c0_22, %c3, %c0_23, %c0_24] : memref<1x8x32x128xbf16, #tpu.memory_space<vmem>>, vector<1x1x32x128xbf16>
    %25 = vector.shape_cast %24 : vector<1x1x32x128xbf16> to vector<32x128xbf16>
    %cst_25 = arith.constant dense<0.000000e+00> : vector<8x128xf32>
    %26 = tpu.matmul %0, %25, %cst_25 {dimension_numbers = #tpu.dot_dimension_numbers<[1], [0], [0], [1], [0, 0, 1, 1], [], []>} : vector<8x32xbf16>, vector<32x128xbf16>, vector<8x128xf32> -> vector<8x128xf32>
    %c3_26 = arith.constant 3 : index
    %c0_27 = arith.constant 0 : index
    %c0_28 = arith.constant 0 : index
    %27 = vector.load %arg3[%c3_26, %c0_27, %c0_28] : memref<8x8x128xf32, #tpu.memory_space<vmem>>, vector<1x8x128xf32>
    %28 = vector.shape_cast %27 : vector<1x8x128xf32> to vector<8x128xf32>
    %29 = vector.shape_cast %26 : vector<8x128xf32> to vector<1x8x128xf32>
    tpu.vector_store %arg3[%c3_26, %c0_27, %c0_28], %29 {strides = array<i32>} : memref<8x8x128xf32, #tpu.memory_space<vmem>>, vector<1x8x128xf32>,
    %30 = arith.mulf %26, %26 : vector<8x128xf32>
    %31 = arith.addf %23, %30 : vector<8x128xf32>
    %c0_29 = arith.constant 0 : index
    %c4 = arith.constant 4 : index
    %c0_30 = arith.constant 0 : index
    %c0_31 = arith.constant 0 : index
    %32 = vector.load %arg2[%c0_29, %c4, %c0_30, %c0_31] : memref<1x8x32x128xbf16, #tpu.memory_space<vmem>>, vector<1x1x32x128xbf16>
    %33 = vector.shape_cast %32 : vector<1x1x32x128xbf16> to vector<32x128xbf16>
    %cst_32 = arith.constant dense<0.000000e+00> : vector<8x128xf32>
    %34 = tpu.matmul %0, %33, %cst_32 {dimension_numbers = #tpu.dot_dimension_numbers<[1], [0], [0], [1], [0, 0, 1, 1], [], []>} : vector<8x32xbf16>, vector<32x128xbf16>, vector<8x128xf32> -> vector<8x128xf32>
    %c4_33 = arith.constant 4 : index
    %c0_34 = arith.constant 0 : index
    %c0_35 = arith.constant 0 : index
    %35 = vector.load %arg3[%c4_33, %c0_34, %c0_35] : memref<8x8x128xf32, #tpu.memory_space<vmem>>, vector<1x8x128xf32>
    %36 = vector.shape_cast %35 : vector<1x8x128xf32> to vector<8x128xf32>
    %37 = vector.shape_cast %34 : vector<8x128xf32> to vector<1x8x128xf32>
    tpu.vector_store %arg3[%c4_33, %c0_34, %c0_35], %37 {strides = array<i32>} : memref<8x8x128xf32, #tpu.memory_space<vmem>>, vector<1x8x128xf32>,
    %38 = arith.mulf %34, %34 : vector<8x128xf32>
    %39 = arith.addf %31, %38 : vector<8x128xf32>
    %c0_36 = arith.constant 0 : index
    %c5 = arith.constant 5 : index
    %c0_37 = arith.constant 0 : index
    %c0_38 = arith.constant 0 : index
    %40 = vector.load %arg2[%c0_36, %c5, %c0_37, %c0_38] : memref<1x8x32x128xbf16, #tpu.memory_space<vmem>>, vector<1x1x32x128xbf16>
    %41 = vector.shape_cast %40 : vector<1x1x32x128xbf16> to vector<32x128xbf16>
    %cst_39 = arith.constant dense<0.000000e+00> : vector<8x128xf32>
    %42 = tpu.matmul %0, %41, %cst_39 {dimension_numbers = #tpu.dot_dimension_numbers<[1], [0], [0], [1], [0, 0, 1, 1], [], []>} : vector<8x32xbf16>, vector<32x128xbf16>, vector<8x128xf32> -> vector<8x128xf32>
    %c5_40 = arith.constant 5 : index
    %c0_41 = arith.constant 0 : index
    %c0_42 = arith.constant 0 : index
    %43 = vector.load %arg3[%c5_40, %c0_41, %c0_42] : memref<8x8x128xf32, #tpu.memory_space<vmem>>, vector<1x8x128xf32>
    %44 = vector.shape_cast %43 : vector<1x8x128xf32> to vector<8x128xf32>
    %45 = vector.shape_cast %42 : vector<8x128xf32> to vector<1x8x128xf32>
    tpu.vector_store %arg3[%c5_40, %c0_41, %c0_42], %45 {strides = array<i32>} : memref<8x8x128xf32, #tpu.memory_space<vmem>>, vector<1x8x128xf32>,
    %46 = arith.mulf %42, %42 : vector<8x128xf32>
    %47 = arith.addf %39, %46 : vector<8x128xf32>
    %c0_43 = arith.constant 0 : index
    %c6 = arith.constant 6 : index
    %c0_44 = arith.constant 0 : index
    %c0_45 = arith.constant 0 : index
    %48 = vector.load %arg2[%c0_43, %c6, %c0_44, %c0_45] : memref<1x8x32x128xbf16, #tpu.memory_space<vmem>>, vector<1x1x32x128xbf16>
    %49 = vector.shape_cast %48 : vector<1x1x32x128xbf16> to vector<32x128xbf16>
    %cst_46 = arith.constant dense<0.000000e+00> : vector<8x128xf32>
    %50 = tpu.matmul %0, %49, %cst_46 {dimension_numbers = #tpu.dot_dimension_numbers<[1], [0], [0], [1], [0, 0, 1, 1], [], []>} : vector<8x32xbf16>, vector<32x128xbf16>, vector<8x128xf32> -> vector<8x128xf32>
    %c6_47 = arith.constant 6 : index
    %c0_48 = arith.constant 0 : index
    %c0_49 = arith.constant 0 : index
    %51 = vector.load %arg3[%c6_47, %c0_48, %c0_49] : memref<8x8x128xf32, #tpu.memory_space<vmem>>, vector<1x8x128xf32>
    %52 = vector.shape_cast %51 : vector<1x8x128xf32> to vector<8x128xf32>
    %53 = vector.shape_cast %50 : vector<8x128xf32> to vector<1x8x128xf32>
    tpu.vector_store %arg3[%c6_47, %c0_48, %c0_49], %53 {strides = array<i32>} : memref<8x8x128xf32, #tpu.memory_space<vmem>>, vector<1x8x128xf32>,
    %54 = arith.mulf %50, %50 : vector<8x128xf32>
    %55 = arith.addf %47, %54 : vector<8x128xf32>
    %c0_50 = arith.constant 0 : index
    %c7 = arith.constant 7 : index
    %c0_51 = arith.constant 0 : index
    %c0_52 = arith.constant 0 : index
    %56 = vector.load %arg2[%c0_50, %c7, %c0_51, %c0_52] : memref<1x8x32x128xbf16, #tpu.memory_space<vmem>>, vector<1x1x32x128xbf16>
    %57 = vector.shape_cast %56 : vector<1x1x32x128xbf16> to vector<32x128xbf16>
    %cst_53 = arith.constant dense<0.000000e+00> : vector<8x128xf32>
    %58 = tpu.matmul %0, %57, %cst_53 {dimension_numbers = #tpu.dot_dimension_numbers<[1], [0], [0], [1], [0, 0, 1, 1], [], []>} : vector<8x32xbf16>, vector<32x128xbf16>, vector<8x128xf32> -> vector<8x128xf32>
    %c7_54 = arith.constant 7 : index
    %c0_55 = arith.constant 0 : index
    %c0_56 = arith.constant 0 : index
    %59 = vector.load %arg3[%c7_54, %c0_55, %c0_56] : memref<8x8x128xf32, #tpu.memory_space<vmem>>, vector<1x8x128xf32>
    %60 = vector.shape_cast %59 : vector<1x8x128xf32> to vector<8x128xf32>
    %61 = vector.shape_cast %58 : vector<8x128xf32> to vector<1x8x128xf32>
    tpu.vector_store %arg3[%c7_54, %c0_55, %c0_56], %61 {strides = array<i32>} : memref<8x8x128xf32, #tpu.memory_space<vmem>>, vector<1x8x128xf32>,
    %62 = arith.mulf %58, %58 : vector<8x128xf32>
    %63 = arith.addf %55, %62 : vector<8x128xf32>
    %cst_57 = arith.constant 1.000000e+00 : f32
    %64 = vector.broadcast %cst_57 : f32 to vector<8x128xf32>
    %65 = arith.addf %64, %63 : vector<8x128xf32>
    %66 = math.sqrt %63 : vector<8x128xf32>
    %67 = arith.mulf %65, %66 : vector<8x128xf32>
    %cst_58 = arith.constant 9.99999971E-10 : f32
    %68 = vector.broadcast %cst_58 : f32 to vector<8x128xf32>
    %69 = arith.addf %67, %68 : vector<8x128xf32>
    %70 = tpu.reciprocal %69 {approx = true} : vector<8x128xf32> -> vector<8x128xf32>
    %71 = arith.mulf %63, %70 : vector<8x128xf32>
    %c0_59 = arith.constant 0 : index
    %c0_60 = arith.constant 0 : index
    %c0_61 = arith.constant 0 : index
    %72 = vector.load %arg3[%c0_59, %c0_60, %c0_61] : memref<8x8x128xf32, #tpu.memory_space<vmem>>, vector<1x8x128xf32>
    %73 = vector.shape_cast %72 : vector<1x8x128xf32> to vector<8x128xf32>
    %74 = arith.mulf %73, %71 : vector<8x128xf32>
    %c0_62 = arith.constant 0 : index
    %c0_63 = arith.constant 0 : index
    %c0_64 = arith.constant 0 : index
    %75 = vector.load %arg3[%c0_62, %c0_63, %c0_64] : memref<8x8x128xf32, #tpu.memory_space<vmem>>, vector<1x8x128xf32>
    %76 = vector.shape_cast %75 : vector<1x8x128xf32> to vector<8x128xf32>
    %77 = vector.shape_cast %74 : vector<8x128xf32> to vector<1x8x128xf32>
    tpu.vector_store %arg3[%c0_62, %c0_63, %c0_64], %77 {strides = array<i32>} : memref<8x8x128xf32, #tpu.memory_space<vmem>>, vector<1x8x128xf32>,
    %c1_65 = arith.constant 1 : index
    %c0_66 = arith.constant 0 : index
    %c0_67 = arith.constant 0 : index
    %78 = vector.load %arg3[%c1_65, %c0_66, %c0_67] : memref<8x8x128xf32, #tpu.memory_space<vmem>>, vector<1x8x128xf32>
    %79 = vector.shape_cast %78 : vector<1x8x128xf32> to vector<8x128xf32>
    %80 = arith.mulf %79, %71 : vector<8x128xf32>
    %c1_68 = arith.constant 1 : index
    %c0_69 = arith.constant 0 : index
    %c0_70 = arith.constant 0 : index
    %81 = vector.load %arg3[%c1_68, %c0_69, %c0_70] : memref<8x8x128xf32, #tpu.memory_space<vmem>>, vector<1x8x128xf32>
    %82 = vector.shape_cast %81 : vector<1x8x128xf32> to vector<8x128xf32>
    %83 = vector.shape_cast %80 : vector<8x128xf32> to vector<1x8x128xf32>
    tpu.vector_store %arg3[%c1_68, %c0_69, %c0_70], %83 {strides = array<i32>} : memref<8x8x128xf32, #tpu.memory_space<vmem>>, vector<1x8x128xf32>,
    %c2_71 = arith.constant 2 : index
    %c0_72 = arith.constant 0 : index
    %c0_73 = arith.constant 0 : index
    %84 = vector.load %arg3[%c2_71, %c0_72, %c0_73] : memref<8x8x128xf32, #tpu.memory_space<vmem>>, vector<1x8x128xf32>
    %85 = vector.shape_cast %84 : vector<1x8x128xf32> to vector<8x128xf32>
    %86 = arith.mulf %85, %71 : vector<8x128xf32>
    %c2_74 = arith.constant 2 : index
    %c0_75 = arith.constant 0 : index
    %c0_76 = arith.constant 0 : index
    %87 = vector.load %arg3[%c2_74, %c0_75, %c0_76] : memref<8x8x128xf32, #tpu.memory_space<vmem>>, vector<1x8x128xf32>
    %88 = vector.shape_cast %87 : vector<1x8x128xf32> to vector<8x128xf32>
    %89 = vector.shape_cast %86 : vector<8x128xf32> to vector<1x8x128xf32>
    tpu.vector_store %arg3[%c2_74, %c0_75, %c0_76], %89 {strides = array<i32>} : memref<8x8x128xf32, #tpu.memory_space<vmem>>, vector<1x8x128xf32>,
    %c3_77 = arith.constant 3 : index
    %c0_78 = arith.constant 0 : index
    %c0_79 = arith.constant 0 : index
    %90 = vector.load %arg3[%c3_77, %c0_78, %c0_79] : memref<8x8x128xf32, #tpu.memory_space<vmem>>, vector<1x8x128xf32>
    %91 = vector.shape_cast %90 : vector<1x8x128xf32> to vector<8x128xf32>
    %92 = arith.mulf %91, %71 : vector<8x128xf32>
    %c3_80 = arith.constant 3 : index
    %c0_81 = arith.constant 0 : index
    %c0_82 = arith.constant 0 : index
    %93 = vector.load %arg3[%c3_80, %c0_81, %c0_82] : memref<8x8x128xf32, #tpu.memory_space<vmem>>, vector<1x8x128xf32>
    %94 = vector.shape_cast %93 : vector<1x8x128xf32> to vector<8x128xf32>
    %95 = vector.shape_cast %92 : vector<8x128xf32> to vector<1x8x128xf32>
    tpu.vector_store %arg3[%c3_80, %c0_81, %c0_82], %95 {strides = array<i32>} : memref<8x8x128xf32, #tpu.memory_space<vmem>>, vector<1x8x128xf32>,
    %c4_83 = arith.constant 4 : index
    %c0_84 = arith.constant 0 : index
    %c0_85 = arith.constant 0 : index
    %96 = vector.load %arg3[%c4_83, %c0_84, %c0_85] : memref<8x8x128xf32, #tpu.memory_space<vmem>>, vector<1x8x128xf32>
    %97 = vector.shape_cast %96 : vector<1x8x128xf32> to vector<8x128xf32>
    %98 = arith.mulf %97, %71 : vector<8x128xf32>
    %c4_86 = arith.constant 4 : index
    %c0_87 = arith.constant 0 : index
    %c0_88 = arith.constant 0 : index
    %99 = vector.load %arg3[%c4_86, %c0_87, %c0_88] : memref<8x8x128xf32, #tpu.memory_space<vmem>>, vector<1x8x128xf32>
    %100 = vector.shape_cast %99 : vector<1x8x128xf32> to vector<8x128xf32>
    %101 = vector.shape_cast %98 : vector<8x128xf32> to vector<1x8x128xf32>
    tpu.vector_store %arg3[%c4_86, %c0_87, %c0_88], %101 {strides = array<i32>} : memref<8x8x128xf32, #tpu.memory_space<vmem>>, vector<1x8x128xf32>,
    %c5_89 = arith.constant 5 : index
    %c0_90 = arith.constant 0 : index
    %c0_91 = arith.constant 0 : index
    %102 = vector.load %arg3[%c5_89, %c0_90, %c0_91] : memref<8x8x128xf32, #tpu.memory_space<vmem>>, vector<1x8x128xf32>
    %103 = vector.shape_cast %102 : vector<1x8x128xf32> to vector<8x128xf32>
    %104 = arith.mulf %103, %71 : vector<8x128xf32>
    %c5_92 = arith.constant 5 : index
    %c0_93 = arith.constant 0 : index
    %c0_94 = arith.constant 0 : index
    %105 = vector.load %arg3[%c5_92, %c0_93, %c0_94] : memref<8x8x128xf32, #tpu.memory_space<vmem>>, vector<1x8x128xf32>
    %106 = vector.shape_cast %105 : vector<1x8x128xf32> to vector<8x128xf32>
    %107 = vector.shape_cast %104 : vector<8x128xf32> to vector<1x8x128xf32>
    tpu.vector_store %arg3[%c5_92, %c0_93, %c0_94], %107 {strides = array<i32>} : memref<8x8x128xf32, #tpu.memory_space<vmem>>, vector<1x8x128xf32>,
    %c6_95 = arith.constant 6 : index
    %c0_96 = arith.constant 0 : index
    %c0_97 = arith.constant 0 : index
    %108 = vector.load %arg3[%c6_95, %c0_96, %c0_97] : memref<8x8x128xf32, #tpu.memory_space<vmem>>, vector<1x8x128xf32>
    %109 = vector.shape_cast %108 : vector<1x8x128xf32> to vector<8x128xf32>
    %110 = arith.mulf %109, %71 : vector<8x128xf32>
    %c6_98 = arith.constant 6 : index
    %c0_99 = arith.constant 0 : index
    %c0_100 = arith.constant 0 : index
    %111 = vector.load %arg3[%c6_98, %c0_99, %c0_100] : memref<8x8x128xf32, #tpu.memory_space<vmem>>, vector<1x8x128xf32>
    %112 = vector.shape_cast %111 : vector<1x8x128xf32> to vector<8x128xf32>
    %113 = vector.shape_cast %110 : vector<8x128xf32> to vector<1x8x128xf32>
    tpu.vector_store %arg3[%c6_98, %c0_99, %c0_100], %113 {strides = array<i32>} : memref<8x8x128xf32, #tpu.memory_space<vmem>>, vector<1x8x128xf32>,
    %c7_101 = arith.constant 7 : index
    %c0_102 = arith.constant 0 : index
    %c0_103 = arith.constant 0 : index
    %114 = vector.load %arg3[%c7_101, %c0_102, %c0_103] : memref<8x8x128xf32, #tpu.memory_space<vmem>>, vector<1x8x128xf32>
    %115 = vector.shape_cast %114 : vector<1x8x128xf32> to vector<8x128xf32>
    %116 = arith.mulf %115, %71 : vector<8x128xf32>
    %c7_104 = arith.constant 7 : index
    %c0_105 = arith.constant 0 : index
    %c0_106 = arith.constant 0 : index
    %117 = vector.load %arg3[%c7_104, %c0_105, %c0_106] : memref<8x8x128xf32, #tpu.memory_space<vmem>>, vector<1x8x128xf32>
    %118 = vector.shape_cast %117 : vector<1x8x128xf32> to vector<8x128xf32>
    %119 = vector.shape_cast %116 : vector<8x128xf32> to vector<1x8x128xf32>
    tpu.vector_store %arg3[%c7_104, %c0_105, %c0_106], %119 {strides = array<i32>} : memref<8x8x128xf32, #tpu.memory_space<vmem>>, vector<1x8x128xf32>,
    return
  }
  func.func @transform_0(%arg0: i32) -> (i32, i32) {
    %c0_i32 = arith.constant 0 : i32
    %c0_i32_0 = arith.constant 0 : i32
    %c0_i32_1 = arith.constant 0 : i32
    return %c0_i32, %c0_i32_0 : i32, i32
  }
  func.func @transform_1(%arg0: i32) -> (i32, i32, i32, i32) {
    %c0_i32 = arith.constant 0 : i32
    %c0_i32_0 = arith.constant 0 : i32
    %c0_i32_1 = arith.constant 0 : i32
    %c0_i32_2 = arith.constant 0 : i32
    return %arg0, %c0_i32, %c0_i32_0, %c0_i32_1 : i32, i32, i32, i32
  }
  func.func @transform_2(%arg0: i32) -> (i32, i32, i32) {
    %c0_i32 = arith.constant 0 : i32
    %c0_i32_0 = arith.constant 0 : i32
    %c0_i32_1 = arith.constant 0 : i32
    return %c0_i32, %c0_i32_0, %arg0 : i32, i32, i32
  }
}

</mosaic_0001>

<bundles_post_ra>
// kernel: primarycaps_forward.1
= control target key start
LH: loop header
LB: loop body
LE: loop exit
PB: predicated region body
PF: predicated region fallthrough
CT: control target
= control target key end

     0   :  { %7 = vsyncpa [#allocation3], 0  ;;  %s1326_s0 = inlined_call_operand.vmem [shape: bf16[8,32], index: 0, kind: input, shape index: {}]   ;;  %s1327_s1 = inlined_call_operand.hbm [shape: bf16[2,8,32,128], index: 1, kind: input, shape index: {}]   ;;  %s1328_s2 = inlined_call_operand.vmem [shape: f32[8,8,256], index: 2, kind: output, shape index: {}]  }
   0x1   :  { %9 = vsyncpa [#allocation3 + $0x1], 0  ;;  %s1140_s9 = smov 0   ;;  %s1142_s10 = smov 0  }
   0x2   :  { %s1144_s11 = smov 0   ;;  %s1146_s12 = smov 0  }
   0x3 LB: > { %s1159_s13 = sadd.s32 4294967295, %s1118_s12   ;;  %s1162_s14 = sadd.s32 1, %s1118_s12   ;;  %s1118_s12 = sphi %s1146_s12, %s1338_s12   ;;  %s1114_s11 = sphi %s1144_s11, %s1337_s11   ;;  %s1110_s10 = sphi %s1142_s10, %s1336_s10   ;;  %s1106_s9 = sphi %s1140_s9, %s1335_s9  }
   0x4   : > { %s40_s15 = ssub.s32 %s1118_s12, %s1162_s14  ;;  %s43_s16 = sadd.s32 1, %s1114_s11 }
   0x5   : > { %p41_p0 = scmp.eq.s32.totalorder %s40_s15, 0  ;;  %p50_p1 = scmp.ne.s32.totalorder %s1114_s11, %s1110_s10 }
   0x6   : > { %p51_p2 = scmp.eq.s32.totalorder %s1118_s12, 0  ;;  %p56_p3 = scmp.ne.s32.totalorder %s1110_s10, %s1106_s9 }
   0x7   : > { %s1172_s17 = scalar_select %p41_p0, %s1114_s11, %s43_s16  }
   0x8   : > { %p1174_p4 = por %p51_p2, %p50_p1  ;;  %p57_p5 = scmp.eq.s32.totalorder %s1159_s13, 0 }
   0x9   : > { %p80_p6 = scmp.eq.s32.totalorder %s1159_s13, 1  ;;  %p997_p8 = scmp.lt.s32.totalorder %s1118_s12, 2 }
   0xa   : > { %p1180_p7 = por %p57_p5, %p56_p3  ;;  %s109_s21 = sand.u32 1, %s1114_s11  }
   0xb   : > { %p1185_p9 = por %p80_p6, %p50_p1  ;;  %s819_s22 = sshll.u32 %s109_s21, 7 }
   0xc   : > { %s902_s23 = sshll.u32 %s1118_s12, 11  ;;  %s113_s27 = scalar_lea.vmem [#allocation2], %s819_s22 }
   0xd   : > { %s1331_s20 = scalar_select %p1185_p9, 1, 0 }
   0xe   : > { %s1194_s26 = scalar_lea.hbm %s1327_s1, %s902_s23  ;;  %s120_s28 = sshll.u32 %s113_s27, 4  ;;  %s1196_s28 = int_to_ptr.vmem [resolvable:$true] %s120_s28 }
   0xf   : > { %p1200_p10 = pnand %p997_p8, %p1174_p4  ;;  %s1205_s30 = scalar_lea.sflag [#allocation3], %s109_s21 }
  0x10   : > { %s1054_s3 = scalar_lea.hbm %s1194_s26, 2048  ;;  %s1059_s6 = scalar_lea.hbm %s1327_s1, 4096 }
  0x11   : > { %p1055_p12 = scmp.ne.s32.totalorder %s1194_s26, %s1054_s3  ;;  %p1056_p13 = pneg %p1200_p10 }
  0x12   : > { %p1060_p2 = scmp.lt.u32.totalorder %s1194_s26, %s1327_s1  ;;  %p1061_p3 = scmp.lt.u32.totalorder %s1059_s6, %s1054_s3 }
  0x13   : > { %p1057_p0 = pnand %p1056_p13, %p1055_p12  ;;  %p1063_p5 = scmp.lt.u32.totalorder %s1054_s3, %s1194_s26 }
  0x14   : > { %p1062_p4 = por %p1061_p3, %p1060_p2 }
  0x15   : > { %p1058_p1 = pneg %p1057_p0 }
  0x16   : > { %p1064_p6 = por %p1063_p5, %p1062_p4 }
  0x18   : > { %p1065_p8 = pnand %p1064_p6, %p1058_p1 }
  0x1a   : > { %1068 = shalt.err (!%p1065_p8)
}
  0x1b   : > { %s1069_s9 = scalar_lea.vmem %s1196_s28, 2048  ;;  %s1120_s15 = smov [#allocation2]  }
  0x1c   : > { %p1070_p12 = scmp.ne.s32.totalorder %s1196_s28, %s1069_s9  ;;  %s1074_s16 = sshll.u32 %s1120_s15, 4  ;;  %s1075_s16 = int_to_ptr.vmem [resolvable:$false] %s1074_s16 }
  0x1d   : > { %s1076_s18 = scalar_lea.vmem %s1075_s16, 4096  ;;  %p1077_p9 = scmp.lt.s32.totalorder %s1196_s28, %s1075_s16 }
  0x1e   : > { %p1072_p0 = pnand %p1070_p12, %p1056_p13  ;;  %p1078_p2 = scmp.lt.s32.totalorder %s1076_s18, %s1069_s9 }
  0x20   : > { %p1073_p11 = pneg %p1072_p0  ;;  %p1079_p3 = por %p1078_p2, %p1077_p9 }
  0x22   : > { %p1080_p4 = pnand %p1079_p3, %p1073_p11 }
  0x24   : > { %1083 = shalt.err (!%p1080_p4)
}
  0x25   : > { %s1121_s21 = smov 64   ;;  %s1122_s22 = smov 4  }
  0x26   : > { %996 = dma.hbm_to_vmem [thread:$0]  (!%p1200_p10), %s1194_s26, 2048, %s1196_s28, %s1205_s30, %s1121_s21, %s1121_s21, %s1122_s22  }
  0x27   : > { %p128_p13 = scmp.lt.s32.totalorder %s1118_s12, 3  ;;  %p1333_p1 = scmp.ge.s32.totalorder %s1118_s12, 1 }
  0x29   : > { %p129_p5 = pnand %p1333_p1, %p128_p13 }
  0x2a   : > { %s1237_s23 = sand.u32 (!%p129_p5), 1, %s1110_s10  }
  0x2b   : > { %132 = sbr.rel (%p129_p5) target bundleno = 349 (0x15d), region = 28  ;;  %s823_s24 = sshll.u32 (!%p129_p5), %s1237_s23, 7 }
  0x2c   : > { %s135_s25 = scalar_lea.sflag (!%p129_p5), [#allocation3], %s1237_s23  ;;  %s1241_s27 = scalar_lea.vmem (!%p129_p5), [#allocation2], %s823_s24 }
  0x32   : > { %1101 = dma.done.wait (%p1180_p7), %s135_s25, 2048  }
  0x33   : > { %1103 = vsyncadd (%p1180_p7), %s135_s25, 4294965248  ;;  %v1123_v0 = vmov 0.0   ;;  %vm1124_vm0 = vmmov 0   ;;  %v1034_v1 = vld [vmem:[%s1241_s27] sm:$0xff]   ;;  %v1035_v2 = vld [vmem:[%s1241_s27 + $0x10] sm:$0xff]   ;;  %vm176_vm1 = vcmask 261120  }
  0x34   : > { %927 = vmatprep.subr.bf16.mxu0 %v1123_v0  ;;  %935 = vmatprep.subr.bf16.mxu1 %v1123_v0  ;;  %v1036_v3 = vld [vmem:[%s1241_s27 + $0x8] sm:$0xff]   ;;  %v1037_v4 = vld [vmem:[%s1241_s27 + $0x18] sm:$0xff]   ;;  %v159_v5 = vld [vmem:[%s1326_s0] sm:$0xf]  ;;  %s824_s26 = sshll.u32 %s1237_s23, 6  ;;  %p1334_p7 = scmp.ne.s32.totalorder %s1331_s20, 0 }
  0x35   : > { %931 = vmatprep.mubr.msk.bf16.mxu0 %vm1124_vm0, %v1123_v0  ;;  %939 = vmatprep.mubr.msk.bf16.mxu1 %vm1124_vm0, %v1123_v0  ;;  %v1038_v6 = vld [vmem:[%s1241_s27 + $0x20] sm:$0xff]   ;;  %v1039_v7 = vld [vmem:[%s1241_s27 + $0x30] sm:$0xff]   ;;  %v1040_v8 = vld [vmem:[%s1241_s27 + $0x28] sm:$0xff]   ;;  %s157_s28 = scalar_lea.vmem [#allocation4], %s824_s26  ;;  %s899_s29 = sshll.u32 (%p1334_p7), %s1159_s13, 3 }
  0x36   : > { %928 = vmatpush3.bf16.msra.mxu0 %v1034_v1  ;;  %936 = vmatpush3.bf16.msra.mxu1 %v1035_v2  ;;  %v1041_v9 = vld [vmem:[%s1241_s27 + $0x38] sm:$0xff]   ;;  %v1042_v10 = vld [vmem:[%s1241_s27 + $0x40] sm:$0xff]   ;;  %v1043_v11 = vld [vmem:[%s1241_s27 + $0x50] sm:$0xff]   ;;  %s693_s4 = scalar_lea.vmem (%p1334_p7), %s1328_s2, %s899_s29 }
  0x37   : > { %929 = vmatprep.subr.bf16.mxu0 %v1123_v0  ;;  %937 = vmatprep.subr.bf16.mxu1 %v1123_v0  ;;  %v1044_v12 = vld [vmem:[%s1241_s27 + $0x48] sm:$0xff]   ;;  %v1045_v13 = vld [vmem:[%s1241_s27 + $0x58] sm:$0xff]   ;;  %v1046_v14 = vld [vmem:[%s1241_s27 + $0x60] sm:$0xff]  }
  0x38   : > { %v1047_v15 = vld [vmem:[%s1241_s27 + $0x70] sm:$0xff]   ;;  %v1048_v16 = vld [vmem:[%s1241_s27 + $0x68] sm:$0xff]   ;;  %v1049_v17 = vld [vmem:[%s1241_s27 + $0x78] sm:$0xff]  }
  0x3a   : > { %930 = vmatpush3.bf16.msra.mxu0 %v1036_v3  ;;  %938 = vmatpush3.bf16.msra.mxu1 %v1037_v4 }
  0x3b   : > { %943 = vmatprep.subr.bf16.mxu0 %v1123_v0  ;;  %951 = vmatprep.subr.bf16.mxu1 %v1123_v0 }
  0x3d   : > { %932 = vmatmul.mubr.msk.bf16.vlgmr.msra.gmra.mrb[0].mxu0 %vm176_vm1, %v159_v5  ;;  %940 = vmatmul.mubr.msk.bf16.vlgmr.msra.gmra.mrb[0].mxu1 %vm176_vm1, %v159_v5 }
  0x3e   : > { %944 = vmatpush3.bf16.msra.mxu0 %v1038_v6  ;;  %952 = vmatpush3.bf16.msra.mxu1 %v1039_v7 }
  0x3f   : > { %945 = vmatprep.subr.bf16.mxu0 %v1123_v0  ;;  %953 = vmatprep.subr.bf16.mxu1 %v1123_v0 }
  0x40   : > { %947 = vmatprep.mubr.msk.bf16.mxu0 %vm1124_vm0, %v1123_v0  ;;  %955 = vmatprep.mubr.msk.bf16.mxu1 %vm1124_vm0, %v1123_v0 }
  0x42   : > { %946 = vmatpush3.bf16.msra.mxu0 %v1040_v8  ;;  %954 = vmatpush3.bf16.msra.mxu1 %v1041_v9 }
  0x43   : > { %959 = vmatprep.subr.bf16.mxu0 %v1123_v0  ;;  %967 = vmatprep.subr.bf16.mxu1 %v1123_v0 }
  0x45   : > { %948 = vmatmul.mubr.msk.bf16.vlgmr.msra.gmra.mrb[4].mxu0 %vm176_vm1, %v159_v5  ;;  %956 = vmatmul.mubr.msk.bf16.vlgmr.msra.gmra.mrb[4].mxu1 %vm176_vm1, %v159_v5 }
  0x46   : > { %960 = vmatpush3.bf16.msra.mxu0 %v1042_v10  ;;  %968 = vmatpush3.bf16.msra.mxu1 %v1043_v11 }
  0x47   : > { %961 = vmatprep.subr.bf16.mxu0 %v1123_v0  ;;  %969 = vmatprep.subr.bf16.mxu1 %v1123_v0 }
  0x48   : > { %963 = vmatprep.mubr.msk.bf16.mxu0 %vm1124_vm0, %v1123_v0  ;;  %971 = vmatprep.mubr.msk.bf16.mxu1 %vm1124_vm0, %v1123_v0 }
  0x4a   : > { %962 = vmatpush3.bf16.msra.mxu0 %v1044_v12  ;;  %970 = vmatpush3.bf16.msra.mxu1 %v1045_v13 }
  0x4b   : > { %975 = vmatprep.subr.bf16.mxu0 %v1123_v0  ;;  %983 = vmatprep.subr.bf16.mxu1 %v1123_v0 }
  0x4d   : > { %964 = vmatmul.mubr.msk.bf16.vlgmr.msra.gmra.mrb[8].mxu0 %vm176_vm1, %v159_v5  ;;  %972 = vmatmul.mubr.msk.bf16.vlgmr.msra.gmra.mrb[8].mxu1 %vm176_vm1, %v159_v5 }
  0x4e   : > { %976 = vmatpush3.bf16.msra.mxu0 %v1046_v14  ;;  %984 = vmatpush3.bf16.msra.mxu1 %v1047_v15 }
  0x4f   : > { %977 = vmatprep.subr.bf16.mxu0 %v1123_v0  ;;  %985 = vmatprep.subr.bf16.mxu1 %v1123_v0 }
  0x50   : > { %979 = vmatprep.mubr.msk.bf16.mxu0 %vm1124_vm0, %v1123_v0  ;;  %987 = vmatprep.mubr.msk.bf16.mxu1 %vm1124_vm0, %v1123_v0 }
  0x52   : > { %978 = vmatpush3.bf16.msra.mxu0 %v1048_v16  ;;  %986 = vmatpush3.bf16.msra.mxu1 %v1049_v17 }
  0x55   : > { %980 = vmatmul.mubr.msk.bf16.vlgmr.msra.gmra.mrb[12].mxu0 %vm176_vm1, %v159_v5  ;;  %988 = vmatmul.mubr.msk.bf16.vlgmr.msra.gmra.mrb[12].mxu1 %vm176_vm1, %v159_v5 }
 0x110   : > { %v214_v18 = vpop.f32.mrb[0].mxu0  ;;  %v273_v20 = vpop.f32.mrb[0].mxu1 }
 0x111   : > { %v221_v19 = vmul.f32 %v214_v18, %v214_v18  ;;  %v933_v21 = vpop.f32.mrb[1].mxu0  ;;  %v281_v22 = vmul.f32 %v273_v20, %v273_v20  ;;  %v941_v23 = vpop.f32.mrb[1].mxu1 }
 0x112   : > { %v217_v24 = vpop.f32.mrb[2].mxu0  ;;  %v276_v25 = vpop.f32.mrb[2].mxu1 }
 0x113   : > { %v934_v26 = vpop.f32.mrb[3].mxu0  ;;  %v282_v27 = vadd.f32 %v281_v22, %v221_v19  ;;  %v942_v28 = vpop.f32.mrb[3].mxu1 }
 0x118   : > { %v334_v29 = vpop.f32.mrb[4].mxu0  ;;  %v395_v31 = vpop.f32.mrb[4].mxu1 }
 0x119   : > { %v342_v30 = vmul.f32 %v334_v29, %v334_v29  ;;  %v949_v32 = vpop.f32.mrb[5].mxu0  ;;  %v403_v33 = vmul.f32 %v395_v31, %v395_v31  ;;  %v957_v34 = vpop.f32.mrb[5].mxu1 }
 0x11a   : > { %v337_v35 = vpop.f32.mrb[6].mxu0  ;;  %v398_v37 = vpop.f32.mrb[6].mxu1 }
 0x11b   : > { %v343_v36 = vadd.f32 %v342_v30, %v282_v27  ;;  %v950_v38 = vpop.f32.mrb[7].mxu0  ;;  %v958_v39 = vpop.f32.mrb[7].mxu1 }
 0x11d   : > { %v404_v40 = vadd.f32 %v403_v33, %v343_v36 }
 0x120   : > { %v456_v41 = vpop.f32.mrb[8].mxu0  ;;  %v517_v43 = vpop.f32.mrb[8].mxu1 }
 0x121   : > { %v464_v42 = vmul.f32 %v456_v41, %v456_v41  ;;  %v965_v44 = vpop.f32.mrb[9].mxu0  ;;  %v525_v45 = vmul.f32 %v517_v43, %v517_v43  ;;  %v973_v46 = vpop.f32.mrb[9].mxu1 }
 0x122   : > { %v459_v47 = vpop.f32.mrb[10].mxu0  ;;  %v520_v49 = vpop.f32.mrb[10].mxu1 }
 0x123   : > { %v465_v48 = vadd.f32 %v464_v42, %v404_v40  ;;  %v966_v50 = vpop.f32.mrb[11].mxu0  ;;  %v974_v51 = vpop.f32.mrb[11].mxu1 }
 0x125   : > { %v526_v52 = vadd.f32 %v525_v45, %v465_v48 }
 0x128   : > { %v578_v53 = vpop.f32.mrb[12].mxu0  ;;  %v639_v55 = vpop.f32.mrb[12].mxu1 }
 0x129   : > { %v586_v54 = vmul.f32 %v578_v53, %v578_v53  ;;  %v981_v56 = vpop.f32.mrb[13].mxu0  ;;  %v647_v57 = vmul.f32 %v639_v55, %v639_v55  ;;  %v989_v58 = vpop.f32.mrb[13].mxu1 }
 0x12a   : > { %v581_v59 = vpop.f32.mrb[14].mxu0  ;;  %v642_v61 = vpop.f32.mrb[14].mxu1 }
 0x12b   : > { %v587_v60 = vadd.f32 %v586_v54, %v526_v52  ;;  %v982_v62 = vpop.f32.mrb[15].mxu0  ;;  %v990_v63 = vpop.f32.mrb[15].mxu1 }
 0x12d   : > { %v648_v0 = vadd.f32 %v647_v57, %v587_v60 }
 0x12f   : > { %1050 = vrsqrt.f32 %v648_v0  ;;  %vm652_vm2 = vcmp.eq.f32.partialorder %v648_v0, inf  ;;  %v655_v3 = vand.u32 2147483648, %v648_v0  ;;  %v649_v4 = vadd.f32 1.0, %v648_v0 }
 0x130   : > { %vm654_vm3 = vcmp.eq.f32.partialorder %v648_v0, 0.0 }
 0x139   : > { %v1051_v1 = vpop.eup %1050 }
 0x13a   : > { %v651_v2 = vmul.f32 %v1051_v1, %v648_v0 }
 0x13c   : > { %v653_v5 = vsel %vm652_vm2, %v648_v0, %v651_v2 }
 0x13d   : > { %v656_v6 = vsel %vm654_vm3, %v655_v3, %v653_v5 }
 0x13e   : > { %v657_v7 = vmul.f32 %v656_v6, %v649_v4 }
 0x140   : > { %v658_v8 = vadd.f32 1e-09, %v657_v7 }
 0x142   : > { %1052 = vrcp.f32 %v658_v8 }
 0x14c   : > { %v1053_v9 = vpop.eup %1052 }
 0x14d   : > { %v660_v10 = vmul.f32 %v1053_v9, %v648_v0 }
 0x14e   : > { %691 = sbr.rel (!%p1334_p7) target bundleno = 349 (0x15d), region = 36 }
 0x14f   : > { %v662_v11 = vmul.f32 %v660_v10, %v214_v18  ;;  %v665_v12 = vmul.f32 %v660_v10, %v273_v20  ;;  %v668_v13 = vmul.f32 %v660_v10, %v334_v29  ;;  %v671_v14 = vmul.f32 %v660_v10, %v395_v31 }
 0x150   : > { %v674_v15 = vmul.f32 %v660_v10, %v456_v41  ;;  %v677_v16 = vmul.f32 %v660_v10, %v517_v43  ;;  %v680_v17 = vmul.f32 %v660_v10, %v578_v53  ;;  %v683_v19 = vmul.f32 %v660_v10, %v639_v55 }
 0x151   : > { %663 = vst [vmem:[%s157_s28] sm:$0xff] %v662_v11  ;;  %885 = vst [vmem:[%s157_s28 + $0x8] sm:$0xff] %v665_v12 }
 0x152   : > { %887 = vst [vmem:[%s157_s28 + $0x10] sm:$0xff] %v668_v13  ;;  %889 = vst [vmem:[%s157_s28 + $0x18] sm:$0xff] %v671_v14 }
 0x153   : > { %891 = vst [vmem:[%s157_s28 + $0x20] sm:$0xff] %v674_v15  ;;  %893 = vst [vmem:[%s157_s28 + $0x28] sm:$0xff] %v677_v16 }
 0x154   : > { %895 = vst [vmem:[%s157_s28 + $0x30] sm:$0xff] %v680_v17  ;;  %897 = vst [vmem:[%s157_s28 + $0x38] sm:$0xff] %v683_v19 }
 0x158   : > { %v735_v18 = vld [vmem:[%s157_s28] sm:$0xff]  ;;  %v737_v20 = vld [vmem:[%s157_s28 + $0x8] sm:$0xff] }
 0x159   : > { %v739_v21 = vld [vmem:[%s157_s28 + $0x10] sm:$0xff]  ;;  %v741_v22 = vld [vmem:[%s157_s28 + $0x18] sm:$0xff]  ;;  %736 = vst [vmem:[%s693_s4] sm:$0xff] %v735_v18  ;;  %738 = vst [vmem:[%s693_s4 + $0x10] sm:$0xff] %v737_v20 }
 0x15a   : > { %v743_v23 = vld [vmem:[%s157_s28 + $0x20] sm:$0xff]  ;;  %v745_v24 = vld [vmem:[%s157_s28 + $0x28] sm:$0xff]  ;;  %740 = vst [vmem:[%s693_s4 + $0x20] sm:$0xff] %v739_v21  ;;  %742 = vst [vmem:[%s693_s4 + $0x30] sm:$0xff] %v741_v22 }
 0x15b   : > { %744 = vst [vmem:[%s693_s4 + $0x40] sm:$0xff] %v743_v23  ;;  %746 = vst [vmem:[%s693_s4 + $0x50] sm:$0xff] %v745_v24  ;;  %v747_v25 = vld [vmem:[%s157_s28 + $0x30] sm:$0xff]  ;;  %v749_v26 = vld [vmem:[%s157_s28 + $0x38] sm:$0xff] }
 0x15c   : > { %748 = vst [vmem:[%s693_s4 + $0x60] sm:$0xff] %v747_v25  ;;  %750 = vst [vmem:[%s693_s4 + $0x70] sm:$0xff] %v749_v26 }
 0x15d PF: > { %p12_p9 = scmp.ge.s32.totalorder %s1162_s14, 4   ;;  %s1335_s9 = smov %s1110_s10 }
 0x15e   : > { %s1336_s10 = smov %s1114_s11  ;;  %s1337_s11 = smov %s1172_s17 }
 0x15f   : > { %s1338_s12 = smov %s1162_s14  ;;  %14 = sbr.rel (!%p12_p9) target bundleno = 3 (0x3), region = 120 }
 0x166   :  { %766 = vsyncpa [#allocation3], 1 }
 0x167   :  { %768 = vsyncpa [#allocation3 + $0x1], 1 }

</bundles_post_ra>
